<compile_context>
chip_gen: v6e
topology: v6e:2x2x1
jax: 0.10.0
libtpu: 0.0.40
codegen_flags: <defaults>
</compile_context>

<pallas_src>
import jax
import jax.numpy as jnp
from jax.experimental import pallas as pl
from jax.experimental.pallas import tpu as pltpu


_LANE = 128                              # TPU lane width
_MIN_BLOCK_ROWS = 8                      # sublane alignment
_TARGET_GRID_STEPS = 4                   # keep >=4 steps so v7x megacore can shard
_TARGET_BLOCK_BYTES = 4 * 1024 * 1024    # ~4 MiB/block -> 16 MiB pipelined in+out
_VMEM_LIMIT_BYTES = 32 * 1024 * 1024     # safe on v5e/v6e (128 MiB) and v7x (64 MiB)


def _log_clamp_kernel(floor_ref, x_ref, o_ref):
    # Elementwise hot path: clamp to floor then natural log (EUP).
    floor = floor_ref[0, 0]                      # f32 scalar from SMEM
    x = x_ref[...].astype(jnp.float32)           # f32 so a 1e-12 floor never underflows
    o_ref[...] = jnp.log(jnp.maximum(x, floor)).astype(o_ref.dtype)


def _round_up(n: int, m: int) -> int:
    return ((n + m - 1) // m) * m


def _choose_block_rows(rows: int, cols: int, elem_bytes: int) -> int:
    """Pick an 8-aligned row-block size: big enough to amortize per-step overhead,
    small enough for VMEM, with >= _TARGET_GRID_STEPS blocks when rows permit."""
    if rows <= _MIN_BLOCK_ROWS:
        return rows  # block equals full row dim (allowed)
    cap = max(
        _MIN_BLOCK_ROWS,
        (_TARGET_BLOCK_BYTES // max(cols * elem_bytes, 1))
        // _MIN_BLOCK_ROWS * _MIN_BLOCK_ROWS,
    )
    nblocks = max(pl.cdiv(rows, cap),
                  min(_TARGET_GRID_STEPS, rows // _MIN_BLOCK_ROWS))
    block_rows = _round_up(pl.cdiv(rows, nblocks), _MIN_BLOCK_ROWS)
    if block_rows >= rows:
        return rows
    return block_rows


def _tiled_log_clamp(x2d: jax.Array, floor: float, out_dtype) -> jax.Array:
    rows, cols = int(x2d.shape[0]), int(x2d.shape[1])
    elem_bytes = jnp.dtype(x2d.dtype).itemsize
    block_rows = _choose_block_rows(rows, cols, elem_bytes)
    grid = (pl.cdiv(rows, block_rows),)
    floor_arr = jnp.full((1, 1), floor, dtype=jnp.float32)
    return pl.pallas_call(
        _log_clamp_kernel,
        out_shape=jax.ShapeDtypeStruct((rows, cols), out_dtype),
        grid_spec=pl.GridSpec(
            grid=grid,
            in_specs=[
                pl.BlockSpec(memory_space=pltpu.MemorySpace.SMEM),   # floor scalar
                pl.BlockSpec((block_rows, cols), lambda i: (i, 0)),
            ],
            out_specs=pl.BlockSpec((block_rows, cols), lambda i: (i, 0)),
        ),
        compiler_params=pltpu.CompilerParams(
            dimension_semantics=("parallel",),
            vmem_limit_bytes=_VMEM_LIMIT_BYTES,
        ),
    )(floor_arr, x2d)


def log_transform(specgram: jax.Array, floor: float = 1e-12) -> jax.Array:
    """Pallas equivalent of torch.log(torch.clamp(specgram, min=floor))."""
    orig_shape = specgram.shape
    orig_dtype = specgram.dtype
    total = 1
    for d in orig_shape:
        total *= int(d)
    if total == 0:
        return specgram  # empty tensor: nothing to compute

    elem_bytes = jnp.dtype(orig_dtype).itemsize

    # Path A: lane-dense factorization with a free (bitcast) reshape.
    if total % _LANE == 0:
        lane = None
        for cand in (1024, 512, 256, 128):
            if total % cand == 0 and (total // cand) >= _MIN_BLOCK_ROWS * _TARGET_GRID_STEPS:
                lane = cand
                break
        if lane is None:
            for cand in (1024, 512, 256, 128):
                if total % cand == 0:
                    lane = cand
                    break
        rows = total // lane
        out2d = _tiled_log_clamp(specgram.reshape(rows, lane), floor, orig_dtype)
        return out2d.reshape(orig_shape)

    # Path B: collapse leading dims (free reshape); block last dim == full last dim.
    last = int(orig_shape[-1]) if len(orig_shape) >= 1 else 1
    last = max(last, 1)
    if last * elem_bytes <= 512 * 1024:
        rows = total // last
        out2d = _tiled_log_clamp(specgram.reshape(rows, last), floor, orig_dtype)
        return out2d.reshape(orig_shape)

    # Path C (rare): huge, 128-unfriendly last dim -> pad + slice fallback.
    rows = pl.cdiv(total, _LANE)
    padded_total = rows * _LANE
    flat = specgram.reshape(-1)
    flat = jnp.pad(flat, (0, padded_total - total), constant_values=1.0)
    out2d = _tiled_log_clamp(flat.reshape(rows, _LANE), floor, orig_dtype)
    return out2d.reshape(-1)[:total].reshape(orig_shape)


if __name__ == "__main__":
    key = jax.random.PRNGKey(0)
    # Small spectrogram-like input: batch=2, freq bins=16, frames=128.
    # abs() keeps most values positive (like a power spectrogram); a few zeros
    # exercise the floor clamp.
    x = jnp.abs(jax.random.normal(key, (2, 16, 128), dtype=jnp.float32))
    x = x.at[:, 0, :4].set(0.0)

    out = log_transform(x, floor=1e-12)
    out = jax.block_until_ready(out)

    # Reference check in plain JAX.
    ref = jnp.log(jnp.maximum(x, 1e-12))
    assert out.shape == x.shape and out.dtype == x.dtype
    assert jnp.allclose(out, ref, rtol=1e-6, atol=1e-6)

    # Also exercise the non-multiple-of-128 path (Path B) for coverage.
    y = jnp.abs(jax.random.normal(key, (3, 7, 50), dtype=jnp.float32))
    out_y = jax.block_until_ready(log_transform(y, floor=1e-12))
    ref_y = jnp.log(jnp.maximum(y, 1e-12))
    assert jnp.allclose(out_y, ref_y, rtol=1e-6, atol=1e-6)

    print("KERNEL_OK")
</pallas_src>

<mosaic_0001>
module attributes {stable_mosaic.version = 11 : i64} {
  func.func @_log_clamp_kernel(%arg0: i32, %arg1: memref<1x1xf32, #tpu.memory_space<smem>>, %arg2: memref<8x128xf32, #tpu.memory_space<vmem>>, %arg3: memref<8x128xf32, #tpu.memory_space<vmem>>) attributes {dimension_semantics = [#tpu.dimension_semantics<parallel>], iteration_bounds = array<i64: 4>, scalar_prefetch = 0 : i64, scratch_operands = 0 : i64, tpu.core_type = #tpu.core_type<tc>, window_params = [{transform_indices = @transform_0, window_bounds = array<i64: 1, 1>}, {transform_indices = @transform_1, window_bounds = array<i64: 8, 128>}, {transform_indices = @transform_2, window_bounds = array<i64: 8, 128>}]} {
    %c0 = arith.constant 0 : index
    %c0_0 = arith.constant 0 : index
    %0 = memref.load %arg1[%c0, %c0_0] : memref<1x1xf32, #tpu.memory_space<smem>>
    %c0_1 = arith.constant 0 : index
    %c0_2 = arith.constant 0 : index
    %1 = vector.load %arg2[%c0_1, %c0_2] : memref<8x128xf32, #tpu.memory_space<vmem>>, vector<8x128xf32>
    %2 = vector.broadcast %0 : f32 to vector<8x128xf32>
    %3 = arith.maximumf %1, %2 : vector<8x128xf32>
    %4 = math.log %3 : vector<8x128xf32>
    %c0_3 = arith.constant 0 : index
    %c0_4 = arith.constant 0 : index
    %5 = vector.load %arg3[%c0_3, %c0_4] : memref<8x128xf32, #tpu.memory_space<vmem>>, vector<8x128xf32>
    tpu.vector_store %arg3[%c0_3, %c0_4], %4 {strides = array<i32>} : memref<8x128xf32, #tpu.memory_space<vmem>>, vector<8x128xf32>,
    return
  }
  func.func @transform_0(%arg0: i32) -> (i32, i32) {
    %c0_i32 = arith.constant 0 : i32
    %c0_i32_0 = arith.constant 0 : i32
    %c0_i32_1 = arith.constant 0 : i32
    return %c0_i32, %c0_i32_0 : i32, i32
  }
  func.func @transform_1(%arg0: i32) -> (i32, i32) {
    %c0_i32 = arith.constant 0 : i32
    %c0_i32_0 = arith.constant 0 : i32
    return %arg0, %c0_i32 : i32, i32
  }
  func.func @transform_2(%arg0: i32) -> (i32, i32) {
    %c0_i32 = arith.constant 0 : i32
    %c0_i32_0 = arith.constant 0 : i32
    return %arg0, %c0_i32 : i32, i32
  }
}

</mosaic_0001>

<bundles_post_ra>
// kernel: tpu_custom_call.1
= control target key start
LH: loop header
LB: loop body
LE: loop exit
PB: predicated region body
PF: predicated region fallthrough
CT: control target
= control target key end

     0   :  { %s564_s0 = inlined_call_operand.<no memory space> [shape: f32[1,1], index: 0, kind: input, shape index: {}]   ;;  %s565_s1 = inlined_call_operand.hbm [shape: f32[32,128], index: 1, kind: input, shape index: {}]   ;;  %s566_s2 = inlined_call_operand.hbm [shape: f32[32,128], index: 2, kind: output, shape index: {}]  }
   0x1   :  { %7 = sst [smem:[#allocation2]] %s564_s0 }
   0x2   :  { %8 = vsyncpa [#allocation4], 0 }
   0x3   :  { %10 = vsyncpa [#allocation4 + $0x1], 0 }
   0x4   :  { %11 = vsyncpa [#allocation5], 0 }
   0x5   :  { %13 = vsyncpa [#allocation5 + $0x1], 0  ;;  %s425_s11 = smov 0   ;;  %s427_s12 = smov 0  }
   0x6   :  { %s429_s13 = smov 0   ;;  %s431_s14 = smov 0  }
   0x7 LB: > { %s446_s0 = sadd.s32 4294967295, %s403_s14   ;;  %s251_s15 = sadd.s32 4294967294, %s403_s14   ;;  %s403_s14 = sphi %s431_s14, %s582_s14   ;;  %s399_s13 = sphi %s429_s13, %s581_s13   ;;  %s395_s12 = sphi %s427_s12, %s580_s12   ;;  %s391_s11 = sphi %s425_s11, %s579_s11  }
   0x8   : > { %s450_s16 = sadd.s32 1, %s403_s14   ;;  %s47_s17 = sadd.s32 1, %s399_s13 }
   0x9   : > { %s44_s18 = ssub.s32 %s403_s14, %s450_s16  ;;  %p54_p0 = scmp.ne.s32.totalorder %s399_s13, %s395_s12 }
   0xa   : > { %p45_p1 = scmp.eq.s32.totalorder %s44_s18, 0  ;;  %p55_p2 = scmp.eq.s32.totalorder %s403_s14, 0 }
   0xb   : > { %p60_p3 = scmp.ne.s32.totalorder %s395_s12, %s391_s11  ;;  %p61_p4 = scmp.eq.s32.totalorder %s446_s0, 0 }
   0xc   : > { %s462_s19 = scalar_select %p45_p1, %s399_s13, %s47_s17  }
   0xd   : > { %p464_p5 = por %p55_p2, %p54_p0  ;;  %p468_p6 = por %p61_p4, %p60_p3 }
   0xe   : > { %p84_p7 = scmp.eq.s32.totalorder %s446_s0, 3  ;;  %p90_p8 = scmp.eq.s32.totalorder %s251_s15, 3 }
   0xf   : > { %s570_s21 = scalar_select %p468_p6, 1, 0 }
  0x10   : > { %p275_p9 = scmp.lt.s32.totalorder %s403_s14, 4  ;;  %p474_p10 = por %p84_p7, %p54_p0 }
  0x11   : > { %p478_p11 = por %p90_p8, %p60_p3  ;;  %s113_s24 = sand.u32 1, %s399_s13  }
  0x12   : > { %s571_s22 = scalar_select %p474_p10, 1, 0 }
  0x13   : > { %s572_s23 = scalar_select %p478_p11, 1, 0 }
  0x14   : > { %s255_s25 = sshll.u32 %s403_s14, 7  ;;  %s254_s26 = sshll.u32 %s113_s24, 3 }
  0x15   : > { %s487_s29 = scalar_lea.hbm %s565_s1, %s255_s25  ;;  %s117_s30 = scalar_lea.vmem [#allocation3], %s254_s26 }
  0x16   : > { %s124_s3 = sshll.u32 %s117_s30, 4  ;;  %p491_p12 = pnand %p275_p9, %p464_p5  ;;  %s495_s3 = int_to_ptr.vmem [resolvable:$true] %s124_s3 }
  0x17   : > { %s114_s5 = scalar_lea.sflag [#allocation4], %s113_s24  ;;  %s311_s6 = scalar_lea.hbm %s487_s29, 128 }
  0x18   : > { %p312_p1 = scmp.ne.s32.totalorder %s487_s29, %s311_s6  ;;  %p313_p2 = pneg %p491_p12 }
  0x19   : > { %s316_s9 = scalar_lea.hbm %s565_s1, 512  ;;  %p317_p5 = scmp.lt.s32.totalorder %s487_s29, %s565_s1 }
  0x1a   : > { %p314_p3 = pnand %p313_p2, %p312_p1  ;;  %p318_p7 = scmp.lt.s32.totalorder %s316_s9, %s311_s6 }
  0x1c   : > { %p315_p4 = pneg %p314_p3  ;;  %p319_p8 = por %p318_p7, %p317_p5 }
  0x1e   : > { %p320_p9 = pnand %p319_p8, %p315_p4 }
  0x20   : > { %323 = shalt.err (!%p320_p9)
}
  0x21   : > { %s324_s17 = scalar_lea.vmem %s495_s3, 128  ;;  %s405_s18 = smov [#allocation3]  }
  0x22   : > { %p325_p13 = scmp.ne.s32.totalorder %s495_s3, %s324_s17  ;;  %s329_s20 = sshll.u32 %s405_s18, 4  ;;  %s330_s20 = int_to_ptr.vmem [resolvable:$false] %s329_s20 }
  0x23   : > { %s331_s24 = scalar_lea.vmem %s330_s20, 256  ;;  %p332_p3 = scmp.lt.s32.totalorder %s495_s3, %s330_s20 }
  0x24   : > { %p327_p0 = pnand %p325_p13, %p313_p2  ;;  %p333_p11 = scmp.lt.s32.totalorder %s331_s24, %s324_s17 }
  0x26   : > { %p328_p1 = pneg %p327_p0  ;;  %p334_p10 = por %p333_p11, %p332_p3 }
  0x28   : > { %p335_p6 = pnand %p334_p10, %p328_p1 }
  0x2a   : > { %338 = shalt.err (!%p335_p6)
}
  0x2b   : > { %270 = dma.hbm_to_vmem [thread:$0]  (!%p491_p12), %s487_s29, 128, %s495_s3, %s114_s5  }
  0x2c   : > { %p574_p4 = scmp.lt.s32.totalorder %s403_s14, 5  ;;  %p575_p5 = scmp.ge.s32.totalorder %s403_s14, 1 }
  0x2e   : > { %p130_p13 = pnand %p575_p5, %p574_p4 }
  0x2f   : > { %s522_s25 = sand.u32 (!%p130_p13), 1, %s395_s12   ;;  %p576_p6 = scmp.ne.s32.totalorder (!%p130_p13), %s570_s21, 0 }
  0x30   : > { %133 = sbr.rel (%p130_p13) target bundleno = 92 (0x5c), region = 28  ;;  %s257_s26 = sshll.u32 (!%p130_p13), %s522_s25, 3 }
  0x31   : > { %s136_s27 = scalar_lea.sflag (!%p130_p13), [#allocation4], %s522_s25  ;;  %s139_s28 = scalar_lea.vmem (!%p130_p13), [#allocation3], %s257_s26 }
  0x35   : > { %382 = dma.done.wait (%p576_p6), %s136_s27, 128  }
  0x36   : > { %384 = vsyncadd (%p576_p6), %s136_s27, 4294967168  ;;  %s160_s29 = sld [smem:[#allocation2]]  ;;  %v161_v0 = vld [vmem:[%s139_s28] sm:$0xff]  ;;  %s159_s30 = scalar_lea.vmem [#allocation6], %s257_s26 }
  0x37   : > { %s181_s3 = sshll.u32 %s159_s30, 4  ;;  %s260_s4 = sshll.u32 %s446_s0, 7  ;;  %s182_s3 = int_to_ptr.vmem [resolvable:$true] %s181_s3 }
  0x38   : > { %s179_s7 = scalar_lea.hbm %s566_s2, %s260_s4  ;;  %s168_s21 = scalar_lea.sflag [#allocation5], %s522_s25 }
  0x39   : > { %s339_s8 = scalar_lea.vmem %s182_s3, 128  ;;  %p577_p11 = scmp.ne.s32.totalorder %s571_s22, 0 }
  0x3a   : > { %p340_p10 = scmp.ne.s32.totalorder %s182_s3, %s339_s8  ;;  %s406_s9 = smov [#allocation6]  }
  0x3b   : > { %s343_s10 = sshll.u32 %s406_s9, 4  ;;  %s344_s10 = int_to_ptr.vmem [resolvable:$false] %s343_s10 }
  0x3c   : > { %v162_v1 = vstv %s160_s29  ;;  %p341_p12 = pnand %p340_p10, %p577_p11  ;;  %s345_s15 = scalar_lea.vmem %s344_s10, 256 }
  0x3d   : > { %v163_v2 = vmax.f32 %v161_v0, %v162_v1  ;;  %p346_p2 = scmp.lt.s32.totalorder %s182_s3, %s344_s10  ;;  %p347_p7 = scmp.lt.s32.totalorder %s345_s15, %s339_s8 }
  0x3e   : > { %p342_p0 = pneg %p341_p12 }
  0x3f   : > { %309 = vlog2.f32 %v163_v2  ;;  %p348_p8 = por %p347_p7, %p346_p2 }
  0x41   : > { %p349_p9 = pnand %p348_p8, %p342_p0 }
  0x4c   : > { %v310_v3 = vpop.eup %309 }
  0x4d   : > { %v165_v4 = vmul.f32 0.6931472, %v310_v3 }
  0x4f   : > { %166 = vst [vmem:[%s159_s30] sm:$0xff] %v165_v4 }
  0x50   : > { %352 = shalt.err (!%p349_p9)
}
  0x51   : > { %s353_s0 = scalar_lea.hbm %s179_s7, 128  ;;  %s357_s20 = scalar_lea.hbm %s566_s2, 512 }
  0x52   : > { %p354_p1 = scmp.ne.s32.totalorder %s179_s7, %s353_s0  ;;  %p358_p5 = scmp.lt.s32.totalorder %s179_s7, %s566_s2 }
  0x53   : > { %p359_p13 = scmp.lt.s32.totalorder %s357_s20, %s353_s0 }
  0x54   : > { %p355_p3 = pnand %p354_p1, %p577_p11 }
  0x55   : > { %p360_p6 = por %p359_p13, %p358_p5 }
  0x56   : > { %p356_p4 = pneg %p355_p3 }
  0x58   : > { %p361_p10 = pnand %p360_p6, %p356_p4 }
  0x5a   : > { %364 = shalt.err (!%p361_p10)
}
  0x5b   : > { %265 = dma.vmem_to_hbm [thread:$0]  (%p577_p11), %s182_s3, 128, %s179_s7, %s168_s21  }
  0x5c PF: > { %p276_p12 = scmp.ge.s32.totalorder %s403_s14, 2  ;;  %s193_s26 = sand.u32 1, %s391_s11  }
  0x5d   : > { %p578_p0 = scmp.ne.s32.totalorder %s572_s23, 0  ;;  %s194_s27 = scalar_lea.sflag [#allocation5], %s193_s26 }
  0x5f   : > { %p272_p2 = pnand %p276_p12, %p578_p0 }
  0x61   : > { %p273_p7 = pneg %p272_p2 }
  0x63   : > { %386 = dma.done.wait (%p273_p7), %s194_s27, 128  }
  0x64   : > { %388 = vsyncadd (%p273_p7), %s194_s27, 4294967168  ;;  %p16_p8 = scmp.ge.s32.totalorder %s450_s16, 6   ;;  %s579_s11 = smov %s395_s12 }
  0x65   : > { %s580_s12 = smov %s399_s13  ;;  %s581_s13 = smov %s462_s19 }
  0x66   : > { %s582_s14 = smov %s450_s16  ;;  %18 = sbr.rel (!%p16_p8) target bundleno = 7 (0x7), region = 73 }
  0x6b   :  { %199 = vsyncpa [#allocation4], 1 }
  0x6c   :  { %201 = vsyncpa [#allocation4 + $0x1], 1 }
  0x6d   :  { %202 = vsyncpa [#allocation5], 1 }
  0x6e   :  { %204 = vsyncpa [#allocation5 + $0x1], 1 }

</bundles_post_ra>
